<compile_context>
chip_gen: v7x
topology: tpu7x:2x2x1
jax: 0.10.0
libtpu: 0.0.40
codegen_flags: <defaults>
</compile_context>

<pallas_src>
import math

import jax
import jax.numpy as jnp
from jax.experimental import pallas as pl
from jax.experimental.pallas import tpu as pltpu


_LANE = 128      # TPU lane width; batch rides the lane axis.
_MAX_TB = 4096   # per-step lane block cap: double-buffered (x + sin + cos) blocks
                 # stay ~2 MiB for half_dim=16 — safe even on v7x's 64 MiB VMEM.


def _learned_sinusoidal_kernel(x_ref, w_ref, sin_ref, cos_ref):
    """Transposed layout: batch on the 128-lane axis, frequencies on sublanes.

    x_ref:   (1, TB)        float32  timesteps for this batch block
    w_ref:   (half_dim, 1)  float32  learned frequencies (resident across grid)
    sin_ref: (half_dim, TB) float32
    cos_ref: (half_dim, TB) float32
    """
    x = x_ref[...]                         # (1, TB)
    w = w_ref[...] * (2.0 * math.pi)       # fold 2*pi once: tiny (half_dim, 1) vreg op
    freqs = w * x                          # (half_dim, TB) outer product via broadcast
    sin_ref[...] = jnp.sin(freqs)          # EUP, fully lane-packed
    cos_ref[...] = jnp.cos(freqs)


def learned_sinusoidal_pos_emb(x, weights):
    """Pallas wrapper.

    x:       (B,)        float32  -- scalar timesteps
    weights: (half_dim,) float32  -- learned frequencies
    returns: (B, 2*half_dim + 1) float32  == concat([x, sin, cos], axis=-1)

    NOTE: for very small B the pure-JAX reference path would be cheaper than a
    pallas_call dispatch; the kernel is kept unconditional here so the harness
    exercises it.
    """
    b = x.shape[0]
    half_dim = weights.shape[0]

    # Pad the batch to a multiple of the lane block: lane-dense stores, no
    # partial grid blocks.  Padded entries (x=0) are computed and sliced off.
    b_pad = max(_LANE, pl.cdiv(b, _LANE) * _LANE)
    tb = min(b_pad, _MAX_TB)
    b_pad = pl.cdiv(b_pad, tb) * tb
    grid = (b_pad // tb,)

    x_f32 = x.astype(jnp.float32)
    x_t = jnp.zeros((1, b_pad), jnp.float32).at[0, :b].set(x_f32)   # (1, B_pad)
    w_t = weights.astype(jnp.float32).reshape(half_dim, 1)          # (half_dim, 1)

    sin_t, cos_t = pl.pallas_call(
        _learned_sinusoidal_kernel,
        out_shape=(
            jax.ShapeDtypeStruct((half_dim, b_pad), jnp.float32),
            jax.ShapeDtypeStruct((half_dim, b_pad), jnp.float32),
        ),
        grid=grid,
        in_specs=[
            pl.BlockSpec((1, tb), lambda i: (0, i)),          # batch block of timesteps
            pl.BlockSpec((half_dim, 1), lambda i: (0, 0)),    # weights stay resident
        ],
        out_specs=(
            pl.BlockSpec((half_dim, tb), lambda i: (0, i)),
            pl.BlockSpec((half_dim, tb), lambda i: (0, i)),
        ),
        compiler_params=pltpu.CompilerParams(
            dimension_semantics=("parallel",),                # shard batch loop on v7x megacore
        ),
    )(x_t, w_t)

    # Layout plumbing in the wrapper (fused by XLA): transpose back to (B, ...)
    # and prepend the raw timestep column, matching torch.cat((x, sin, cos), -1).
    sin = sin_t.T[:b]
    cos = cos_t.T[:b]
    return jnp.concatenate([x_f32[:, None], sin, cos], axis=-1)


def _reference(x, weights):
    """Pure-JAX reference mirroring the PyTorch forward."""
    x2 = x[:, None]
    freqs = x2 * weights[None, :] * 2.0 * math.pi
    return jnp.concatenate([x2, jnp.sin(freqs), jnp.cos(freqs)], axis=-1)


if __name__ == "__main__":
    # Module config: dim must be even.  Small, consistent shapes.
    dim = 32
    half_dim = dim // 2
    batch = 8

    key = jax.random.PRNGKey(0)
    kx, kw = jax.random.split(key)
    # Deterministic synthetic parameter (stands in for nn.Parameter(torch.randn(half_dim)))
    weights = jax.random.normal(kw, (half_dim,), dtype=jnp.float32)
    # Timesteps (continuous, like diffusion times)
    x = jax.random.uniform(kx, (batch,), dtype=jnp.float32)

    out = learned_sinusoidal_pos_emb(x, weights)
    out = jax.block_until_ready(out)

    ref = _reference(x, weights)
    assert out.shape == (batch, dim + 1), out.shape
    assert jnp.allclose(out, ref, atol=1e-5, rtol=1e-5), "mismatch vs reference"

    print("KERNEL_OK")
</pallas_src>

<mosaic_0001>
module attributes {stable_mosaic.version = 11 : i64} {
  func.func @_learned_sinusoidal_kernel(%arg0: i32, %arg1: memref<1x128xf32, #tpu.memory_space<vmem>>, %arg2: memref<16x1xf32, #tpu.memory_space<vmem>>, %arg3: memref<16x128xf32, #tpu.memory_space<vmem>>, %arg4: memref<16x128xf32, #tpu.memory_space<vmem>>) attributes {dimension_semantics = [#tpu.dimension_semantics<parallel>], iteration_bounds = array<i64: 1>, scalar_prefetch = 0 : i64, scratch_operands = 0 : i64, tpu.core_type = #tpu.core_type<tc>, window_params = [{transform_indices = @transform_0, window_bounds = array<i64: 1, 128>}, {pipeline_mode = #tpu.pipeline_mode<synchronous>, transform_indices = @transform_1, window_bounds = array<i64: 16, 1>}, {transform_indices = @transform_2, window_bounds = array<i64: 16, 128>}, {transform_indices = @transform_3, window_bounds = array<i64: 16, 128>}]} {
    %c0 = arith.constant 0 : index
    %c0_0 = arith.constant 0 : index
    %0 = vector.load %arg1[%c0, %c0_0] : memref<1x128xf32, #tpu.memory_space<vmem>>, vector<1x128xf32>
    %c0_1 = arith.constant 0 : index
    %c0_2 = arith.constant 0 : index
    %1 = vector.load %arg2[%c0_1, %c0_2] : memref<16x1xf32, #tpu.memory_space<vmem>>, vector<16x1xf32>
    %cst = arith.constant 6.28318548 : f32
    %2 = vector.broadcast %cst : f32 to vector<16x1xf32>
    %3 = arith.mulf %1, %2 : vector<16x1xf32>
    %4 = vector.broadcast %3 : vector<16x1xf32> to vector<16x128xf32>
    %5 = vector.broadcast %0 : vector<1x128xf32> to vector<16x128xf32>
    %6 = arith.mulf %4, %5 : vector<16x128xf32>
    %7 = math.sin %6 : vector<16x128xf32>
    %c0_3 = arith.constant 0 : index
    %c0_4 = arith.constant 0 : index
    %8 = vector.load %arg3[%c0_3, %c0_4] : memref<16x128xf32, #tpu.memory_space<vmem>>, vector<16x128xf32>
    tpu.vector_store %arg3[%c0_3, %c0_4], %7 {strides = array<i32>} : memref<16x128xf32, #tpu.memory_space<vmem>>, vector<16x128xf32>,
    %9 = math.cos %6 : vector<16x128xf32>
    %c0_5 = arith.constant 0 : index
    %c0_6 = arith.constant 0 : index
    %10 = vector.load %arg4[%c0_5, %c0_6] : memref<16x128xf32, #tpu.memory_space<vmem>>, vector<16x128xf32>
    tpu.vector_store %arg4[%c0_5, %c0_6], %9 {strides = array<i32>} : memref<16x128xf32, #tpu.memory_space<vmem>>, vector<16x128xf32>,
    return
  }
  func.func @transform_0(%arg0: i32) -> (i32, i32) {
    %c0_i32 = arith.constant 0 : i32
    %c0_i32_0 = arith.constant 0 : i32
    return %c0_i32, %arg0 : i32, i32
  }
  func.func @transform_1(%arg0: i32) -> (i32, i32) {
    %c0_i32 = arith.constant 0 : i32
    %c0_i32_0 = arith.constant 0 : i32
    %c0_i32_1 = arith.constant 0 : i32
    return %c0_i32, %c0_i32_0 : i32, i32
  }
  func.func @transform_2(%arg0: i32) -> (i32, i32) {
    %c0_i32 = arith.constant 0 : i32
    %c0_i32_0 = arith.constant 0 : i32
    return %c0_i32, %arg0 : i32, i32
  }
  func.func @transform_3(%arg0: i32) -> (i32, i32) {
    %c0_i32 = arith.constant 0 : i32
    %c0_i32_0 = arith.constant 0 : i32
    return %c0_i32, %arg0 : i32, i32
  }
}

</mosaic_0001>

<bundles_post_ra>
// kernel: tpu_custom_call.1
= control target key start
LH: loop header
LB: loop body
LE: loop exit
PB: predicated region body
PF: predicated region fallthrough
CT: control target
= control target key end

     0   :  { %9 = vsyncpa [#allocation3], 0  ;;  %v581_v2 = vmov 0   ;;  %s712_s0 = inlined_call_operand.vmem [shape: f32[1,128], index: 0, kind: input, shape index: {}]   ;;  %s713_s1 = inlined_call_operand.vmem [shape: f32[16,1], index: 1, kind: input, shape index: {}]   ;;  %s714_s2 = inlined_call_operand.hbm [shape: f32[16,128], index: 2, kind: output, shape index: {0}]   ;;  %s715_s3 = inlined_call_operand.hbm [shape: f32[16,128], index: 3, kind: output, shape index: {1}]  }
   0x1   :  { %v16_v0 = vld [vmem:[%s713_s1] sm:$0xff]  ;;  %v17_v1 = vld [vmem:[%s713_s1 + $0x8] sm:$0xff]  ;;  %524 = vset.pattern.permute.xlu0 %v581_v2 }
   0x2   :  { %v18_v3 = vmul.f32 6.2831855, %v16_v0  ;;  %v19_v4 = vmul.f32 6.2831855, %v17_v1 }
   0x4   :  { %22 = vperm.xlu0 %524, %v18_v3  }
   0x5   :  { %10 = vsyncpa [#allocation5], 0  ;;  %v488_v5 = vld [vmem:[%s712_s0] ss:$0 sm:$0xff]  ;;  %v582_v26 = vmov 683565275  }
   0x6   :  { %v583_v30 = vmov 2475754826   ;;  %v584_v32 = vmov 2131351028   ;;  %v585_v34 = vmov 2102212464  }
   0x7   :  { %v586_v36 = vmov 920167782   ;;  %v587_v43 = vmov 1326507024   ;;  %s588_s0 = smov [#allocation2]   ;;  %s589_s18 = smov [#allocation4]  }
   0x8   :  { %27 = vperm.xlu0 %524, %v19_v4   ;;  %s461_s1 = sshll.u32 %s588_s0, 4  ;;  %s473_s19 = sshll.u32 %s589_s18, 4  ;;  %s462_s1 = int_to_ptr.vmem [resolvable:$true] %s461_s1  ;;  %s681_s19 = int_to_ptr.vmem [resolvable:$true] %s473_s19 }
   0x9   :  { %s533_s20 = scalar_lea.vmem %s462_s1, 256  ;;  %p538_p1 = scmp.lt.s32.totalorder %s462_s1, %s462_s1 }
   0xa   :  { %p534_p0 = scmp.ne.s32.totalorder %s462_s1, %s533_s20  ;;  %p539_p2 = scmp.lt.s32.totalorder %s533_s20, %s533_s20 }
   0xc   :  { %p540_p3 = por %p539_p2, %p538_p1 }
   0xe   :  { %p541_p4 = pnand %p540_p3, %p534_p0 }
  0x83   :  { %v23_v6 = vpop.permute.xlu0 %22 }
  0x84   :  { %v621_v7 = vmul.f32 %v488_v5, %v23_v6 }
  0x86   :  { %v38_v8 = vand.u32 2147483647, %v621_v7  ;;  %v41_v9 = vand.u32 2139095040, %v621_v7  ;;  %vm40_vm14 = vcmp.lt.s32.totalorder %v621_v7, 0 }
  0x87   :  { %v28_v10 = vpop.permute.xlu0 %27 }
  0x88   :  { %v42_v11 = vshrl.u32 %v41_v9, 23  ;;  %v625_v12 = vmul.f32 %v488_v5, %v28_v10  ;;  %v45_v13 = vand.u32 8388607, %v38_v8  ;;  %vm39_vm15 = vcmp.le.f32.partialorder %v38_v8, 0.7853982 }
  0x8a   :  { %v489_v14 = vadd.s32 4294967169, %v42_v11  ;;  %v145_v15 = vand.u32 2139095040, %v625_v12  ;;  %v46_v17 = vor.u32 8388608, %v45_v13  ;;  %v142_v19 = vand.u32 2147483647, %v625_v12 }
  0x8c   :  { %v48_v16 = vadd.s32 1, %v489_v14  ;;  %v146_v18 = vshrl.u32 %v145_v15, 23  ;;  %v631_v24 = vshll.u32 %v46_v17, 8  ;;  %v149_v28 = vand.u32 8388607, %v142_v19 }
  0x8e   :  { %vm49_vm0 = vcmp.gt.s32.totalorder %v48_v16, 0  ;;  %v493_v21 = vadd.s32 4294967169, %v146_v18  ;;  %v150_v58 = vor.u32 8388608, %v149_v28 }
  0x8f   :  { %v50_v20 = vsel %vm49_vm0, %v48_v16, 0  ;;  %vm144_vm0 = vcmp.lt.s32.totalorder %v625_v12, 0 }
  0x90   :  { %v51_v22 = vshrl.u32 %v50_v20, 5  ;;  %v52_v23 = vand.u32 31, %v50_v20  ;;  %v152_v29 = vadd.s32 1, %v493_v21  ;;  %v190_v9 = vshll.u32 %v150_v58, 8 }
  0x92   :  { %v53_v25 = vsub.s32 32, %v52_v23  ;;  %v55_v27 = vshll.u32 %v582_v26, %v52_v23  ;;  %v58_v31 = vshll.u32 %v583_v30, %v52_v23  ;;  %v61_v33 = vshll.u32 %v584_v32, %v52_v23 }
  0x93   :  { %v64_v35 = vshll.u32 %v585_v34, %v52_v23  ;;  %v67_v37 = vshll.u32 %v586_v36, %v52_v23  ;;  %vm70_vm1 = vcmp.lt.s32.totalorder %v51_v22, 1  ;;  %vm72_vm2 = vcmp.lt.s32.totalorder %v51_v22, 3 }
  0x94   :  { %v56_v38 = vshrl.u32 %v583_v30, %v53_v25  ;;  %v59_v39 = vshrl.u32 %v584_v32, %v53_v25  ;;  %v62_v40 = vshrl.u32 %v585_v34, %v53_v25  ;;  %v54_v41 = vshrl.u32 %v582_v26, %v53_v25 }
  0x95   :  { %v65_v42 = vshrl.u32 %v586_v36, %v53_v25  ;;  %v68_v44 = vshrl.u32 %v587_v43, %v53_v25  ;;  %vm153_vm3 = vcmp.gt.s32.totalorder %v152_v29, 0  ;;  %vm73_vm4 = vcmp.lt.s32.totalorder %v51_v22, 4 }
  0x96   :  { %v57_v45 = vor.u32 %v56_v38, %v55_v27  ;;  %v60_v46 = vor.u32 %v59_v39, %v58_v31  ;;  %v63_v47 = vor.u32 %v62_v40, %v61_v33  ;;  %v154_v50 = vsel %vm153_vm3, %v152_v29, 0 }
  0x97   :  { %v66_v48 = vor.u32 %v65_v42, %v64_v35  ;;  %v69_v49 = vor.u32 %v68_v44, %v67_v37  ;;  %vm71_vm5 = vcmp.lt.s32.totalorder %v51_v22, 2  ;;  %v156_v61 = vand.u32 31, %v154_v50 }
  0x98   :  { %v74_v51 = vsel %vm70_vm1, %v54_v41, %v57_v45  ;;  %v75_v52 = vsel %vm73_vm4, %v63_v47, 2102212464  ;;  %v78_v53 = vsel %vm70_vm1, %v57_v45, %v60_v46  ;;  %v82_v54 = vsel %vm70_vm1, %v60_v46, %v63_v47 }
  0x99   :  { %v76_v55 = vsel %vm72_vm2, %v60_v46, %v75_v52  ;;  %v79_v56 = vsel %vm73_vm4, %v66_v48, 920167782  ;;  %v83_v57 = vsel %vm73_vm4, %v69_v49, 1326507024  ;;  %v155_v5 = vshrl.u32 %v154_v50, 5 }
  0x9a   :  { %v80_v59 = vsel %vm72_vm2, %v63_v47, %v79_v56  ;;  %v84_v60 = vsel %vm72_vm2, %v66_v48, %v83_v57  ;;  %v77_v62 = vsel %vm71_vm5, %v74_v51, %v76_v55  ;;  %v157_v6 = vsub.s32 32, %v156_v61 }
  0x9b   :  { %v81_v63 = vsel %vm71_vm5, %v78_v53, %v80_v59  ;;  %v85_v0 = vsel %vm71_vm5, %v82_v54, %v84_v60  ;;  %v93_v10 = vmul.u32 %v631_v24, %v77_v62  ;;  %v159_v11 = vshll.u32 %v582_v26, %v156_v61 }
  0x9c   :  { %v644_v1 = vmul.u32.u64.low %v631_v24, %v85_v0  ;;  %v645_v2 = vmul.u32.u64.high %v631_v24, %v85_v0, %v644_v1  ;;  %v648_v3 = vmul.u32.u64.low %v631_v24, %v81_v63  ;;  %v649_v4 = vmul.u32.u64.high %v631_v24, %v81_v63, %v648_v3 }
  0x9d   :  { %v162_v13 = vshll.u32 %v583_v30, %v156_v61  ;;  %v165_v14 = vshll.u32 %v584_v32, %v156_v61  ;;  %v160_v15 = vshrl.u32 %v583_v30, %v157_v6  ;;  %v163_v16 = vshrl.u32 %v584_v32, %v157_v6 }
  0x9e   :  { %v166_v17 = vshrl.u32 %v585_v34, %v157_v6  ;;  %v168_v18 = vshll.u32 %v585_v34, %v156_v61  ;;  %vm95_vm6 = vc.u32 %v645_v2, %v648_v3  ;;  %v96_v20 = vadd.s32 1, %v649_v4 }
  0x9f   :  { %v169_v21 = vshrl.u32 %v586_v36, %v157_v6  ;;  %v171_v22 = vshll.u32 %v586_v36, %v156_v61  ;;  %v161_v23 = vor.u32 %v160_v15, %v159_v11  ;;  %v164_v25 = vor.u32 %v163_v16, %v162_v13 }
  0xa0   :  { %v167_v27 = vor.u32 %v166_v17, %v165_v14  ;;  %v172_v28 = vshrl.u32 %v587_v43, %v157_v6  ;;  %v97_v24 = vsel %vm95_vm6, %v96_v20, %v649_v4  ;;  %vm174_vm7 = vcmp.lt.s32.totalorder %v155_v5, 1 }
  0xa1   :  { %v170_v29 = vor.u32 %v169_v21, %v168_v18  ;;  %vm177_vm8 = vcmp.lt.s32.totalorder %v155_v5, 4  ;;  %v98_v30 = vadd.s32 %v97_v24, %v93_v10  ;;  %vm176_vm9 = vcmp.lt.s32.totalorder %v155_v5, 3 }
  0xa2   :  { %v173_v31 = vor.u32 %v172_v28, %v171_v22  ;;  %v179_v32 = vsel %vm177_vm8, %v167_v27, 2102212464  ;;  %v158_v33 = vshrl.u32 %v582_v26, %v157_v6  ;;  %v182_v34 = vsel %vm174_vm7, %v161_v23, %v164_v25 }
  0xa3   :  { %v183_v35 = vsel %vm177_vm8, %v170_v29, 920167782  ;;  %v186_v37 = vsel %vm174_vm7, %v164_v25, %v167_v27  ;;  %v99_v38 = vadd.s32 536870912, %v98_v30  ;;  %vm175_vm10 = vcmp.lt.s32.totalorder %v155_v5, 2 }
  0xa4   :  { %v184_v36 = vsel %vm176_vm9, %v167_v27, %v183_v35  ;;  %v187_v39 = vsel %vm177_vm8, %v173_v31, 1326507024  ;;  %v178_v40 = vsel %vm174_vm7, %v158_v33, %v161_v23  ;;  %v180_v41 = vsel %vm176_vm9, %v164_v25, %v179_v32 }
  0xa5   :  { %v185_v42 = vsel %vm175_vm10, %v182_v34, %v184_v36  ;;  %v188_v43 = vsel %vm176_vm9, %v170_v29, %v187_v39  ;;  %v100_v44 = vshrl.u32 %v99_v38, 30  ;;  %v181_v50 = vsel %vm175_vm10, %v178_v40, %v180_v41 }
  0xa6   :  { %v189_v45 = vsel %vm175_vm10, %v186_v37, %v188_v43  ;;  %v659_v46 = vmul.u32.u64.low %v190_v9, %v185_v42  ;;  %v660_v47 = vmul.u32.u64.high %v190_v9, %v185_v42, %v659_v46  ;;  %v197_v53 = vmul.u32 %v190_v9, %v181_v50 }
  0xa7   :  { %v662_v48 = vmul.u32.u64.low %v190_v9, %v189_v45  ;;  %v663_v49 = vmul.u32.u64.high %v190_v9, %v189_v45, %v662_v48  ;;  %v101_v26 = vshll.u32 %v100_v44, 30  ;;  %v94_v1 = vadd.s32 %v648_v3, %v645_v2 }
  0xa8   :  { %v200_v52 = vadd.s32 1, %v660_v47  ;;  %v124_v23 = vsub.s32 4, %v100_v44  ;;  %vm143_vm1 = vcmp.le.f32.partialorder %v142_v19, 0.7853982  ;;  %vm130_vm8 = vweird.f32 %v621_v7 }
  0xa9   :  { %v102_v51 = vsub.s32 %v98_v30, %v101_v26  ;;  %vm199_vm11 = vc.u32 %v663_v49, %v659_v46  ;;  %v198_v2 = vadd.s32 %v659_v46, %v663_v49 }
  0xaa   :  { %v201_v55 = vsel %vm199_vm11, %v200_v52, %v660_v47  ;;  %v125_v32 = vsel %vm40_vm14, %v124_v23, %v100_v44 }
  0xab   :  { %v104_v54 = vsub.s32 0, %v102_v51  ;;  %v202_v56 = vadd.s32 %v201_v55, %v197_v53  ;;  %v127_v38 = vsel %vm39_vm15, 0, %v125_v32 }
  0xac   :  { %v131_v40 = vadd.s32 3, %v127_v38  ;;  %v341_v45 = vand.u32 3, %v127_v38 }
  0xad   :  { %v490_v57 = vmin.u32 %v104_v54, %v102_v51  ;;  %v203_v58 = vadd.s32 536870912, %v202_v56 }
  0xae   :  { %v132_v8 = vand.u32 3, %v131_v40  ;;  %vm346_vm2 = vcmp.eq.s32.totalorder %v341_v45, 2  ;;  %vm343_vm5 = vcmp.eq.s32.totalorder %v341_v45, 0  ;;  %vm342_vm7 = vcmp.lt.s32.totalorder %v341_v45, 2 }
  0xaf   :  { %v106_v59 = vclz %v490_v57  ;;  %v204_v60 = vshrl.u32 %v203_v58, 30 }
  0xb0   :  { %vm137_vm3 = vcmp.eq.s32.totalorder %v132_v8, 2  ;;  %vm134_vm4 = vcmp.eq.s32.totalorder %v132_v8, 0  ;;  %vm133_vm6 = vcmp.lt.s32.totalorder %v132_v8, 2 }
  0xb1   :  { %v491_v61 = vadd.s32 4294967294, %v106_v59  ;;  %v205_v62 = vshll.u32 %v204_v60, 30  ;;  %v228_v42 = vsub.s32 4, %v204_v60 }
  0xb3   :  { %vm492_vm12 = vcmp.lt.s32.totalorder %v491_v61, 0  ;;  %v206_v0 = vsub.s32 %v202_v56, %v205_v62  ;;  %v229_v46 = vsel %vm144_vm0, %v228_v42, %v204_v60 }
  0xb4   :  { %v109_v63 = vsel %vm492_vm12, 0, %v491_v61 }
  0xb5   :  { %v110_v4 = vsub.s32 32, %v109_v63  ;;  %v114_v5 = vsub.s32 4294967266, %v109_v63  ;;  %v208_v6 = vsub.s32 0, %v206_v0  ;;  %v111_v9 = vshll.u32 %v102_v51, %v109_v63 }
  0xb6   :  { %v231_v51 = vsel %vm143_vm1, 0, %v229_v46 }
  0xb7   :  { %v112_v10 = vshrl.u32 %v94_v1, %v110_v4  ;;  %v115_v11 = vadd.s32 127, %v114_v5  ;;  %v494_v13 = vmin.u32 %v208_v6, %v206_v0  ;;  %v235_v56 = vadd.s32 3, %v231_v51 }
  0xb8   :  { %v444_v61 = vand.u32 3, %v231_v51 }
  0xb9   :  { %v113_v14 = vor.u32 %v112_v10, %v111_v9  ;;  %v116_v15 = vshll.u32 %v115_v11, 23  ;;  %v210_v16 = vclz %v494_v13  ;;  %v236_v60 = vand.u32 3, %v235_v56 }
  0xba   :  { %vm449_vm10 = vcmp.eq.s32.totalorder %v444_v61, 2  ;;  %vm446_vm12 = vcmp.eq.s32.totalorder %v444_v61, 0 }
  0xbb   :  { %v117_v17 = vor.u32 4788187, %v116_v15  ;;  %v495_v18 = vadd.s32 4294967294, %v210_v16  ;;  %v120_v21 = vcvt.s32.f32 %v113_v14  ;;  %vm241_vm9 = vcmp.eq.s32.totalorder %v236_v60, 2 }
  0xbc   :  { %vm238_vm11 = vcmp.eq.s32.totalorder %v236_v60, 0 }
  0xbd   :  { %v118_v20 = vand.u32 2147483647, %v117_v17  ;;  %vm496_vm13 = vcmp.lt.s32.totalorder %v495_v18, 0 }
  0xbe   :  { %v213_v25 = vsel %vm496_vm13, 0, %v495_v18  ;;  %vm237_vm13 = vcmp.lt.s32.totalorder %v236_v60, 2 }
  0xbf   :  { %v121_v22 = vmul.f32 %v120_v21, %v118_v20  ;;  %v214_v3 = vsub.s32 32, %v213_v25  ;;  %v218_v27 = vsub.s32 4294967266, %v213_v25  ;;  %v215_v24 = vshll.u32 %v206_v0, %v213_v25 }
  0xc1   :  { %v122_v28 = vxor.u32 2147483648, %v121_v22  ;;  %v216_v29 = vshrl.u32 %v198_v2, %v214_v3  ;;  %v219_v30 = vadd.s32 127, %v218_v27 }
  0xc3   :  { %v123_v31 = vsel %vm40_vm14, %v122_v28, %v121_v22  ;;  %v217_v34 = vor.u32 %v216_v29, %v215_v24  ;;  %v220_v35 = vshll.u32 %v219_v30, 23  ;;  %vm445_vm14 = vcmp.lt.s32.totalorder %v444_v61, 2 }
  0xc4   :  { %v126_v33 = vsel %vm39_vm15, %v621_v7, %v123_v31  ;;  %vm234_vm15 = vweird.f32 %v625_v12 }
  0xc5   :  { %525 = vcosq.f32 %v126_v33  ;;  %v221_v37 = vor.u32 4788187, %v220_v35  ;;  %v224_v39 = vcvt.s32.f32 %v217_v34 }
  0xc6   :  { %527 = vsinq.f32 %v126_v33 }
  0xc7   :  { %v222_v36 = vand.u32 2147483647, %v221_v37 }
  0xc9   :  { %v225_v41 = vmul.f32 %v224_v39, %v222_v36 }
  0xcb   :  { %v226_v43 = vxor.u32 2147483648, %v225_v41 }
  0xcd   :  { %v227_v44 = vsel %vm144_vm0, %v226_v43, %v225_v41 }
  0xce   :  { %v230_v48 = vsel %vm143_vm1, %v625_v12, %v227_v44 }
  0xcf   :  { %v526_v47 = vpop.eup %525  ;;  %529 = vcosq.f32 %v230_v48 }
  0xd0   :  { %v528_v49 = vpop.eup %527  ;;  %v138_v26 = vxor.u32 2147483648, %v526_v47  ;;  %531 = vsinq.f32 %v230_v48 }
  0xd1   :  { %v135_v50 = vxor.u32 2147483648, %v528_v49 }
  0xd2   :  { %v139_v52 = vsel %vm137_vm3, %v138_v26, %v528_v49  ;;  %v348_v53 = vsel %vm346_vm2, %v138_v26, %v528_v49 }
  0xd3   :  { %v136_v54 = vsel %vm134_vm4, %v526_v47, %v135_v50  ;;  %v345_v19 = vsel %vm343_vm5, %v526_v47, %v135_v50 }
  0xd4   :  { %v140_v55 = vsel %vm133_vm6, %v136_v54, %v139_v52  ;;  %v349_v57 = vsel %vm342_vm7, %v345_v19, %v348_v53 }
  0xd5   :  { %v141_v58 = vsel %vm130_vm8, nan, %v140_v55  ;;  %v350_v59 = vsel %vm130_vm8, nan, %v349_v57 }
  0xd6   :  { %246 = vst [vmem:[#allocation2] sm:$0xff] %v141_v58  ;;  %454 = vst [vmem:[#allocation4] sm:$0xff] %v350_v59 }
  0xd9   :  { %v530_v62 = vpop.eup %529 }
  0xda   :  { %v532_v63 = vpop.eup %531  ;;  %v242_v0 = vxor.u32 2147483648, %v530_v62 }
  0xdb   :  { %v239_v1 = vxor.u32 2147483648, %v532_v63 }
  0xdc   :  { %v243_v4 = vsel %vm241_vm9, %v242_v0, %v532_v63  ;;  %v451_v7 = vsel %vm449_vm10, %v242_v0, %v532_v63 }
  0xdd   :  { %v240_v5 = vsel %vm238_vm11, %v530_v62, %v239_v1  ;;  %v448_v6 = vsel %vm446_vm12, %v530_v62, %v239_v1 }
  0xde   :  { %v244_v9 = vsel %vm237_vm13, %v240_v5, %v243_v4  ;;  %v452_v10 = vsel %vm445_vm14, %v448_v6, %v451_v7 }
  0xdf   :  { %v245_v11 = vsel %vm234_vm15, nan, %v244_v9  ;;  %v453_v13 = vsel %vm234_vm15, nan, %v452_v10 }
  0xe0   :  { %247 = vst [vmem:[#allocation2 + $0x8] sm:$0xff] %v245_v11  ;;  %455 = vst [vmem:[#allocation4 + $0x8] sm:$0xff] %v453_v13 }
  0xe1   :  { %544 = shalt.err (!%p541_p4)
}
  0xe2   :  { %s545_s23 = scalar_lea.hbm %s714_s2, 256 }
  0xe3   :  { %p546_p5 = scmp.ne.s32.totalorder %s714_s2, %s545_s23  ;;  %p549_p6 = scmp.lt.u32.totalorder %s545_s23, %s714_s2 }
  0xe5   :  { %p551_p7 = pnand %p549_p6, %p546_p5 }
  0xe7   :  { %554 = shalt.err (!%p551_p7)
}
  0xe8   :  { %s590_s28 = smov 128   ;;  %s591_s29 = smov 8  }
  0xe9   :  { %467 = dma.vmem_to_hbm [thread:$0]  %s462_s1, 256, %s714_s2, [#allocation3], %s590_s28, %s590_s28, %s591_s29  }
  0xea   :  { %s555_s5 = scalar_lea.vmem %s681_s19, 256  ;;  %p560_p9 = scmp.lt.s32.totalorder %s681_s19, %s681_s19 }
  0xeb   :  { %p556_p8 = scmp.ne.s32.totalorder %s681_s19, %s555_s5  ;;  %p561_p10 = scmp.lt.s32.totalorder %s555_s5, %s555_s5 }
  0xed   :  { %p562_p11 = por %p561_p10, %p560_p9 }
  0xef   :  { %p563_p12 = pnand %p562_p11, %p556_p8 }
  0xf1   :  { %566 = shalt.err (!%p563_p12)
}
  0xf2   :  { %s567_s8 = scalar_lea.hbm %s715_s3, 256 }
  0xf3   :  { %p568_p13 = scmp.ne.s32.totalorder %s715_s3, %s567_s8  ;;  %p571_p0 = scmp.lt.u32.totalorder %s567_s8, %s715_s3 }
  0xf5   :  { %p573_p1 = pnand %p571_p0, %p568_p13 }
  0xf7   :  { %576 = shalt.err (!%p573_p1)
}
  0xf8   :  { %479 = dma.vmem_to_hbm [thread:$0]  %s681_s19, 256, %s715_s3, [#allocation5], %s590_s28, %s590_s28, %s591_s29  }
  0xf9   :  { %577 = dma.done.wait [#allocation3], 256  }
  0xfa   :  { %578 = vsyncadd [#allocation3], 4294967040 }
  0xfb   :  { %579 = dma.done.wait [#allocation5], 256  }
  0xfc   :  { %580 = vsyncadd [#allocation5], 4294967040 }
  0xfd   :  { %486 = vsyncpa [#allocation3], 1 }
  0xfe   :  { %487 = vsyncpa [#allocation5], 1 }

</bundles_post_ra>
